<compile_context>
chip_gen: v5e
topology: v5e:2x2
jax: 0.10.0
libtpu: 0.0.40
codegen_flags: <defaults>
</compile_context>

<pallas_src>
import jax
import jax.numpy as jnp
from jax import lax
from jax.experimental import pallas as pl
from jax.experimental.pallas import tpu as pltpu


_LANE = 128
_SUBLANE = 8
_DEFAULT_VMEM_BUDGET = 20 * 1024 * 1024   # tile-footprint target (fits every gen)
_VMEM_LIMIT_CAP = 56 * 1024 * 1024        # stay under v7x's 64 MiB physical VMEM


def _round_up(x: int, m: int) -> int:
    return ((x + m - 1) // m) * m


# ----------------------------- kernels --------------------------------------

def _linear_nok_kernel(x_ref, w_ref, b_ref, o_ref):
    """Whole-K tile: out = x @ W_t + b (no K grid axis, no accumulator)."""
    o_ref[...] = (
        jnp.dot(x_ref[...], w_ref[...], preferred_element_type=jnp.float32)
        + b_ref[...]
    ).astype(o_ref.dtype)


def _linear_k_kernel(x_ref, w_ref, b_ref, o_ref, acc_ref):
    """K-tiled path: f32 VMEM accumulator carried over the last grid axis."""
    k = pl.program_id(2)

    @pl.when(k == 0)
    def _():
        acc_ref[...] = jnp.zeros_like(acc_ref)

    acc_ref[...] += jnp.dot(x_ref[...], w_ref[...],
                            preferred_element_type=jnp.float32)

    @pl.when(k == pl.num_programs(2) - 1)
    def _():
        o_ref[...] = (acc_ref[...] + b_ref[...]).astype(o_ref.dtype)


# --------------------------- tile selection ----------------------------------

def _pick_tm(batch: int):
    """Return (tm, Mp): small-batch path if B<=32, else largest tile with <=10%
    padded rows, else the tile minimizing padding."""
    mp8 = _round_up(batch, _SUBLANE)
    if mp8 <= 32:
        return mp8, mp8
    best = None
    for tm in (512, 256, 128, 64, 32, 16, 8):
        mp = _round_up(batch, tm)
        if (mp - batch) / mp <= 0.10:
            return tm, mp
        if best is None or mp < best[1]:
            best = (tm, mp)
    return best


def _divisor_candidates(dim: int, cands):
    out = sorted({c for c in cands if c <= dim and dim % c == 0}, reverse=True)
    return out or [dim]


# ----------------------------- forward ---------------------------------------

def make_linear_forward(w, b, *, compute_dtype=jnp.float32,
                        vmem_budget_bytes=_DEFAULT_VMEM_BUDGET):
    """One-time prep for nn.Linear(Din->Dout): transpose W to (Din, Dout) and
    pad to lane-dense 128-multiples ONCE (off the forward hot path). Returns a
    jitted forward(x) = x @ W.T + b."""
    dout, din = w.shape
    assert b.shape == (dout,)
    kp = _round_up(din, _LANE)     # contraction dim
    np_ = _round_up(dout, _LANE)   # output feature (lane) dim

    wt_p = jnp.pad(jnp.asarray(w).T,
                   ((0, kp - din), (0, np_ - dout))).astype(compute_dtype)
    b_p = jnp.pad(jnp.asarray(b), (0, np_ - dout)).astype(jnp.float32).reshape(1, np_)
    ibytes = jnp.dtype(compute_dtype).itemsize

    @jax.jit
    def forward(x):
        batch = x.shape[0]
        assert x.shape == (batch, din)
        obytes = jnp.dtype(x.dtype).itemsize

        tm, mp = _pick_tm(batch)
        tn_cands = _divisor_candidates(np_, (1024, 512, 256, 128, np_))

        def nok_footprint(tn):
            return (2 * (tm * kp + kp * tn) * ibytes + 2 * tn * 4
                    + 2 * tm * tn * obytes)

        def k_footprint(tn, tk):
            return (2 * (tm * tk + tk * tn) * ibytes + 2 * tn * 4
                    + tm * tn * 4 + 2 * tm * tn * obytes)

        # Path 1: whole-K tiles (tk = Kp) — no K grid axis, no accumulator.
        plan = None
        for tn in tn_cands:
            if nok_footprint(tn) <= vmem_budget_bytes:
                plan = ("nok", tn, kp)
                break

        # Path 2: K-tiled with f32 accumulator (only when whole-K doesn't fit).
        if plan is None and kp > _LANE:
            tk_cands = [c for c in _divisor_candidates(kp, (2048, 1024, 512, 256, 128))
                        if c < kp] or [_LANE]
            for tn in tn_cands:
                for tk in tk_cands:
                    if k_footprint(tn, tk) <= vmem_budget_bytes:
                        plan = ("k", tn, tk)
                        break
                if plan is not None:
                    break
            if plan is None:
                plan = ("k", _LANE, _LANE)   # minimal-tile fallback
        if plan is None:
            plan = ("nok", _LANE, kp)        # kp == 128: nothing smaller exists

        kind, tn, tk = plan

        # v7x: 2 TensorCores shard the "parallel" axes — avoid a 1x1 parallel grid.
        if mp // tm == 1 and np_ // tn == 1 and np_ >= 2 * _LANE:
            tn = np_ // 2 if (np_ // 2) % _LANE == 0 else _LANE

        footprint = nok_footprint(tn) if kind == "nok" else k_footprint(tn, tk)
        vmem_limit = int(min(_VMEM_LIMIT_CAP,
                             max(32 * 1024 * 1024, 2 * footprint)))

        # Per-call padding touches only x; weights/bias were padded once at init.
        xp = x
        if (mp, kp) != (batch, din):
            xp = jnp.pad(x, ((0, mp - batch), (0, kp - din)))
        xp = xp.astype(compute_dtype)

        if kind == "nok":
            out_p = pl.pallas_call(
                _linear_nok_kernel,
                out_shape=jax.ShapeDtypeStruct((mp, np_), x.dtype),
                grid_spec=pltpu.PrefetchScalarGridSpec(
                    num_scalar_prefetch=0,
                    grid=(mp // tm, np_ // tn),
                    in_specs=[
                        pl.BlockSpec((tm, kp), lambda i, j: (i, 0)),   # x tile
                        pl.BlockSpec((kp, tn), lambda i, j: (0, j)),   # W.T tile
                        pl.BlockSpec((1, tn), lambda i, j: (0, j)),    # bias tile
                    ],
                    out_specs=pl.BlockSpec((tm, tn), lambda i, j: (i, j)),
                ),
                compiler_params=pltpu.CompilerParams(
                    dimension_semantics=("parallel", "parallel"),
                    vmem_limit_bytes=vmem_limit,
                ),
            )(xp, wt_p, b_p)
        else:
            out_p = pl.pallas_call(
                _linear_k_kernel,
                out_shape=jax.ShapeDtypeStruct((mp, np_), x.dtype),
                grid_spec=pltpu.PrefetchScalarGridSpec(
                    num_scalar_prefetch=0,
                    grid=(mp // tm, np_ // tn, kp // tk),
                    in_specs=[
                        pl.BlockSpec((tm, tk), lambda i, j, k: (i, k)),  # x tile
                        pl.BlockSpec((tk, tn), lambda i, j, k: (k, j)),  # W.T tile
                        pl.BlockSpec((1, tn), lambda i, j, k: (0, j)),   # bias tile
                    ],
                    out_specs=pl.BlockSpec((tm, tn), lambda i, j, k: (i, j)),
                    scratch_shapes=[pltpu.VMEM((tm, tn), jnp.float32)],
                ),
                compiler_params=pltpu.CompilerParams(
                    dimension_semantics=("parallel", "parallel", "arbitrary"),
                    vmem_limit_bytes=vmem_limit,
                ),
            )(xp, wt_p, b_p)

        if (mp, np_) != (batch, dout):
            out_p = out_p[:batch, :dout]
        return out_p

    return forward


if __name__ == "__main__":
    key = jax.random.PRNGKey(0)
    kx, kw, kb = jax.random.split(key, 3)

    # ---- primary check: Linear(input_dim, input_dim) at a small synthetic
    # input_dim (moments.csv is unavailable). Uses the whole-K GEMV-like path.
    input_dim, batch = 32, 8
    bound = 1.0 / jnp.sqrt(jnp.float32(input_dim))
    w = jax.random.uniform(kw, (input_dim, input_dim), jnp.float32, -bound, bound)
    b = jax.random.uniform(kb, (input_dim,), jnp.float32, -bound, bound)
    x = jax.random.normal(kx, (batch, input_dim), jnp.float32)

    fwd = make_linear_forward(w, b)            # weights padded/transposed ONCE here
    out = jax.block_until_ready(fwd(x))
    ref = jnp.dot(x, w.T, precision=lax.Precision.HIGHEST) + b
    assert out.shape == (batch, input_dim)
    assert jnp.allclose(out, ref, atol=1e-5, rtol=1e-5)

    # ---- secondary check: multi-block whole-K path (B=300 -> tm=64, Mp=320,
    # grid (5, 1), tn = Np = 384), no batch over-padding.
    D2, B2 = 320, 300
    bound2 = 1.0 / jnp.sqrt(jnp.float32(D2))
    w2 = jax.random.uniform(kw, (D2, D2), jnp.float32, -bound2, bound2)
    b2 = jax.random.uniform(kb, (D2,), jnp.float32, -bound2, bound2)
    x2 = jax.random.normal(kx, (B2, D2), jnp.float32)
    ref2 = jnp.dot(x2, w2.T, precision=lax.Precision.HIGHEST) + b2

    fwd2 = make_linear_forward(w2, b2)
    out2 = jax.block_until_ready(fwd2(x2))
    assert out2.shape == (B2, D2)
    assert jnp.allclose(out2, ref2, atol=1e-4, rtol=1e-4)

    # ---- third check: artificially small VMEM budget forces the K-tiled
    # accumulator kernel (grid (5, 3, 3), pl.when init/epilogue).
    fwd3 = make_linear_forward(w2, b2, vmem_budget_bytes=384 * 1024)
    out3 = jax.block_until_ready(fwd3(x2))
    assert jnp.allclose(out3, ref2, atol=1e-4, rtol=1e-4)

    print("KERNEL_OK")
</pallas_src>

<mosaic_0001>
module attributes {stable_mosaic.version = 11 : i64} {
  func.func @_linear_nok_kernel(%arg0: i32, %arg1: i32, %arg2: memref<8x128xf32, #tpu.memory_space<vmem>>, %arg3: memref<128x128xf32, #tpu.memory_space<vmem>>, %arg4: memref<1x128xf32, #tpu.memory_space<vmem>>, %arg5: memref<8x128xf32, #tpu.memory_space<vmem>>) attributes {dimension_semantics = [#tpu.dimension_semantics<parallel>, #tpu.dimension_semantics<parallel>], iteration_bounds = array<i64: 1, 1>, scalar_prefetch = 0 : i64, scratch_operands = 0 : i64, tpu.core_type = #tpu.core_type<tc>, window_params = [{transform_indices = @transform_0, window_bounds = array<i64: 8, 128>}, {transform_indices = @transform_1, window_bounds = array<i64: 128, 128>}, {transform_indices = @transform_2, window_bounds = array<i64: 1, 128>}, {transform_indices = @transform_3, window_bounds = array<i64: 8, 128>}]} {
    %c0 = arith.constant 0 : index
    %c0_0 = arith.constant 0 : index
    %0 = vector.load %arg2[%c0, %c0_0] : memref<8x128xf32, #tpu.memory_space<vmem>>, vector<8x128xf32>
    %c0_1 = arith.constant 0 : index
    %c0_2 = arith.constant 0 : index
    %1 = vector.load %arg3[%c0_1, %c0_2] : memref<128x128xf32, #tpu.memory_space<vmem>>, vector<128x128xf32>
    %cst = arith.constant dense<0.000000e+00> : vector<8x128xf32>
    %2 = tpu.matmul %0, %1, %cst {dimension_numbers = #tpu.dot_dimension_numbers<[1], [0], [0], [1], [0, 0, 1, 1], [], []>} : vector<8x128xf32>, vector<128x128xf32>, vector<8x128xf32> -> vector<8x128xf32>
    %c0_3 = arith.constant 0 : index
    %c0_4 = arith.constant 0 : index
    %3 = vector.load %arg4[%c0_3, %c0_4] : memref<1x128xf32, #tpu.memory_space<vmem>>, vector<1x128xf32>
    %4 = vector.broadcast %3 : vector<1x128xf32> to vector<8x128xf32>
    %5 = arith.addf %2, %4 : vector<8x128xf32>
    %c0_5 = arith.constant 0 : index
    %c0_6 = arith.constant 0 : index
    %6 = vector.load %arg5[%c0_5, %c0_6] : memref<8x128xf32, #tpu.memory_space<vmem>>, vector<8x128xf32>
    tpu.vector_store %arg5[%c0_5, %c0_6], %5 {strides = array<i32>} : memref<8x128xf32, #tpu.memory_space<vmem>>, vector<8x128xf32>,
    return
  }
  func.func @transform_0(%arg0: i32, %arg1: i32) -> (i32, i32) {
    %c0_i32 = arith.constant 0 : i32
    %c0_i32_0 = arith.constant 0 : i32
    return %arg0, %c0_i32 : i32, i32
  }
  func.func @transform_1(%arg0: i32, %arg1: i32) -> (i32, i32) {
    %c0_i32 = arith.constant 0 : i32
    %c0_i32_0 = arith.constant 0 : i32
    return %c0_i32, %arg1 : i32, i32
  }
  func.func @transform_2(%arg0: i32, %arg1: i32) -> (i32, i32) {
    %c0_i32 = arith.constant 0 : i32
    %c0_i32_0 = arith.constant 0 : i32
    return %c0_i32, %arg1 : i32, i32
  }
  func.func @transform_3(%arg0: i32, %arg1: i32) -> (i32, i32) {
    %c0_i32 = arith.constant 0 : i32
    return %arg0, %arg1 : i32, i32
  }
}

</mosaic_0001>

<bundles_post_ra>
// kernel: forward.1
= control target key start
LH: loop header
LB: loop body
LE: loop exit
PB: predicated region body
PF: predicated region fallthrough
CT: control target
= control target key end

     0   :  { %8 = vsyncpa [#allocation3], 0  ;;  %s183_s0 = inlined_call_operand.vmem [shape: f32[8,128], index: 0, kind: input, shape index: {}]   ;;  %s184_s1 = inlined_call_operand.hbm [shape: f32[128,128], index: 1, kind: input, shape index: {}]   ;;  %s185_s2 = inlined_call_operand.vmem [shape: f32[1,128], index: 2, kind: input, shape index: {}]   ;;  %s186_s3 = inlined_call_operand.hbm [shape: f32[8,128], index: 3, kind: output, shape index: {}]  }
   0x1   :  { %9 = vsyncpa [#allocation4], 0  ;;  %s16_s14 = sshll.u32 %s184_s1, 4  ;;  %s147_s15 = smov [#allocation2]   ;;  %s17_s14 = int_to_ptr.hbm [resolvable:$true] %s16_s14 }
   0x2   :  { %s18_s16 = sshll.u32 %s147_s15, 4  ;;  %s148_s17 = smov 128   ;;  %s19_s16 = int_to_ptr.vmem [resolvable:$true] %s18_s16 }
   0x3   :  { %s149_s18 = smov 8  }
   0x4   :  { %24 = dma.hbm_to_vmem [thread:$0]  %s17_s14, 2048, %s19_s16, [#allocation3], %s148_s17, %s148_s17, %s149_s18  }
   0x5   :  { %143 = dma.done.wait [#allocation3], 2048  }
   0x6   :  { %144 = vsyncadd [#allocation3], 4294965248  ;;  %v47_v0 = vld [vmem:[#allocation2 + $0x78] sm:$0xff]  ;;  %v46_v1 = vld [vmem:[#allocation2 + $0x70] sm:$0xff]  ;;  %s150_s22 = smov [#allocation5]   ;;  %s80_s26 = sshll.u32 %s186_s3, 4  ;;  %s81_s26 = int_to_ptr.hbm [resolvable:$true] %s80_s26 }
   0x7   :  { %52 = vmatpush.msra.mxu0 %v47_v0  ;;  %v45_v2 = vld [vmem:[#allocation2 + $0x68] sm:$0xff]  ;;  %v44_v3 = vld [vmem:[#allocation2 + $0x60] sm:$0xff]  ;;  %v43_v4 = vld [vmem:[#allocation2 + $0x58] sm:$0xff]  ;;  %s78_s23 = sshll.u32 %s150_s22, 4  ;;  %s79_s23 = int_to_ptr.vmem [resolvable:$true] %s78_s23 }
   0x8   :  { %v42_v5 = vld [vmem:[#allocation2 + $0x50] sm:$0xff]  ;;  %v41_v6 = vld [vmem:[#allocation2 + $0x48] sm:$0xff]  ;;  %v40_v7 = vld [vmem:[#allocation2 + $0x40] sm:$0xff] }
   0x9   :  { %53 = vmatpush.msra.mxu0 %v46_v1  ;;  %v39_v8 = vld [vmem:[#allocation2 + $0x38] sm:$0xff]  ;;  %v38_v9 = vld [vmem:[#allocation2 + $0x30] sm:$0xff]  ;;  %v37_v10 = vld [vmem:[#allocation2 + $0x28] sm:$0xff] }
   0xa   :  { %v36_v11 = vld [vmem:[#allocation2 + $0x20] sm:$0xff]  ;;  %v35_v12 = vld [vmem:[#allocation2 + $0x18] sm:$0xff]  ;;  %v34_v13 = vld [vmem:[#allocation2 + $0x10] sm:$0xff] }
   0xb   :  { %54 = vmatpush.msra.mxu0 %v45_v2  ;;  %v33_v14 = vld [vmem:[#allocation2 + $0x8] sm:$0xff]  ;;  %v32_v15 = vld [vmem:[#allocation2] sm:$0xff] }
   0xc   :  { %v31_v16 = vld [vmem:[%s183_s0] sm:$0xff] }
   0xd   :  { %55 = vmatpush.msra.mxu0 %v44_v3  ;;  %v94_v17 = vld [vmem:[%s185_s2] ss:$0 sm:$0xff] }
   0xf   :  { %56 = vmatpush.msra.mxu0 %v43_v4 }
  0x11   :  { %57 = vmatpush.msra.mxu0 %v42_v5 }
  0x13   :  { %58 = vmatpush.msra.mxu0 %v41_v6 }
  0x15   :  { %59 = vmatpush.msra.mxu0 %v40_v7 }
  0x17   :  { %60 = vmatpush.msra.mxu0 %v39_v8 }
  0x19   :  { %61 = vmatpush.msra.mxu0 %v38_v9 }
  0x1b   :  { %62 = vmatpush.msra.mxu0 %v37_v10 }
  0x1d   :  { %63 = vmatpush.msra.mxu0 %v36_v11 }
  0x1f   :  { %64 = vmatpush.msra.mxu0 %v35_v12 }
  0x21   :  { %65 = vmatpush.msra.mxu0 %v34_v13 }
  0x23   :  { %66 = vmatpush.msra.mxu0 %v33_v14 }
  0x25   :  { %67 = vmatpush.msra.mxu0 %v32_v15 }
  0x26   :  { %68 = vmatmul.f32.vlgmr.msra.gmra.mxu0 %v31_v16 }
  0xa3   :  { %v69_v18 = vpop.f32.mrf.mxu0 }
  0xa4   :  { %v70_v19 = vadd.f32 %v94_v17, %v69_v18 }
  0xa6   :  { %72 = vst [vmem:[#allocation5] sm:$0xff] %v70_v19 }
  0xa7   :  { %83 = dma.vmem_to_hbm [thread:$0]  %s79_s23, 128, %s81_s26, [#allocation4]  }
  0xa8   :  { %145 = dma.done.wait [#allocation4], 128  }
  0xa9   :  { %146 = vsyncadd [#allocation4], 4294967168 }
  0xaa   :  { %88 = vsyncpa [#allocation3], 1 }
  0xab   :  { %89 = vsyncpa [#allocation4], 1 }

</bundles_post_ra>
